<compile_context>
chip_gen: v7x
topology: tpu7x:2x2x1
jax: 0.10.0
libtpu: 0.0.40
codegen_flags: <defaults>
</compile_context>

<pallas_src>
import jax
import jax.numpy as jnp
from jax.experimental import pallas as pl
from jax.experimental.pallas import tpu as pltpu


# ----------------------------------------------------------------------------
# Sinusoidal table, identical to the PyTorch __init__.
# ----------------------------------------------------------------------------
def build_pe_table(embed_dim: int, max_len: int = 500) -> jax.Array:
    assert embed_dim % 2 == 0
    p_seq = jnp.arange(0, max_len, dtype=jnp.float32)[:, None]              # (max_len, 1)
    p_idx = 10000.0 ** (jnp.arange(0, embed_dim // 2, dtype=jnp.float32)
                        * (-2.0 / embed_dim))                               # (D/2,)
    outer = p_seq * p_idx                                                   # (max_len, D/2)
    pe = jnp.zeros((max_len, embed_dim), dtype=jnp.float32)
    even_idx = jnp.arange(0, embed_dim // 2) * 2
    pe = pe.at[:, even_idx].set(jnp.sin(outer))
    pe = pe.at[:, even_idx + 1].set(jnp.cos(outer))
    return pe                                                               # (max_len, D), f32


# ----------------------------------------------------------------------------
# Kernel: one broadcast add per tile.  pe stays f32; cast once on the store.
# ----------------------------------------------------------------------------
def _add_pe_kernel(x_ref, pe_ref, o_ref):
    o_ref[...] = (x_ref[...] + pe_ref[...]).astype(o_ref.dtype)


# ----------------------------------------------------------------------------
# Tiling helpers (all trace-time Python on static shapes).
# ----------------------------------------------------------------------------
def _floor_mult(x: int, m: int) -> int:
    return (x // m) * m


def _vmem_limit_bytes() -> int:
    """Scoped-VMEM budget with headroom: ~40 MiB on v7x (64 MiB physical),
    64 MiB on v5e/v6e (128 MiB physical)."""
    try:
        cap = int(pltpu.get_tpu_info().vmem_capacity_bytes)
    except Exception:
        cap = 64 << 20
    return min(64 << 20, max(32 << 20, (cap * 5) // 8))


def _plan_flat(N: int, C: int, itemsize: int, target_bytes: int):
    """Tile sizes for the flattened (N, C) layout. Returns (tN, tC) where
    tC is a multiple of 128 (or == C) and tN is a multiple of 8 (or == N)."""
    if C >= 128:
        if N * 128 * itemsize <= target_bytes:
            # Full batch of rows per block; tile lane-dense columns.
            tN = N
            cols = max(128, _floor_mult(target_bytes // (tN * itemsize), 128))
            tC = min(_floor_mult(C, 128), cols)
        else:
            # Huge N: keep columns lane-dense (>= 1024 lanes when available),
            # tile rows in multiples of 8 instead of collapsing tC to 128.
            tC = min(_floor_mult(C, 128), 1024)
            rows = max(8, _floor_mult(target_bytes // (tC * itemsize), 8))
            tN = N if N <= rows else rows
    else:
        # Narrow flattened dim: block spans all columns, tile rows if large.
        tC = C
        rows = max(8, _floor_mult(target_bytes // (max(tC, 1) * itemsize), 8))
        tN = N if N <= rows else rows
    return tN, tC


def _plan_fold(S1: int, C2: int, itemsize: int, target_bytes: int):
    """Tile sizes for the folded (N, S1, C2) layout (C2 % 128 == 0, S1 >= 8)."""
    tC2 = min(C2, max(128, _floor_mult(target_bytes // (8 * itemsize), 128)))
    rows = max(8, _floor_mult(target_bytes // (tC2 * itemsize), 8))
    tS1 = S1 if S1 <= rows else rows
    return tS1, tC2


# ----------------------------------------------------------------------------
# Wrapper (call under jax.jit).
# ----------------------------------------------------------------------------
def positional_encoding(x: jax.Array, pe: jax.Array, *, donate_x: bool = False) -> jax.Array:
    """x: (N, S, D); pe: (max_len, D) f32 table with max_len >= S. Returns x + pe[:S]."""
    N, S, D = x.shape
    assert pe.shape[1] == D and pe.shape[0] >= S
    itemsize = jnp.dtype(x.dtype).itemsize
    pe_s = pe[:S, :].astype(jnp.float32)          # add is done in f32 (PyTorch-like numerics)
    vmem_limit = _vmem_limit_bytes()
    io_alias = {0: 0} if donate_x else {}         # optional: alias x -> out when x is donated

    # ---- layout selection ----------------------------------------------------
    # Default: flatten to (N, S*D) (lane-dense columns, N on sublanes).
    # If N < 8, try folding S = S1*S2 so sublanes (S1 >= 8) and lanes
    # (S2*D % 128 == 0) are both dense.
    fold_S2 = 0
    if N < 8:
        for cand in range(1, S + 1):
            if S % cand == 0 and (cand * D) % 128 == 0 and (S // cand) >= 8:
                fold_S2 = cand
                break

    cost = pl.CostEstimate(
        flops=N * S * D,                                   # one add per element
        transcendentals=0,
        bytes_accessed=2 * N * S * D * itemsize + S * D * 4,  # read x, write out, read pe once
    )

    if fold_S2 == 0:
        # -------- Path A: flattened (N, C) layout ------------------------------
        C = S * D
        x2 = x.reshape(N, C)
        pe2 = pe_s.reshape(1, C)
        target = min(8 << 20, vmem_limit // 5)    # x + out double-buffered (+ tiny pe row)
        tN, tC = _plan_flat(N, C, itemsize, target)

        # v7x megacore: make sure large inputs give >= 2 parallel grid steps.
        if pl.cdiv(N, tN) * pl.cdiv(C, tC) < 2 and N * C * itemsize >= (1 << 21):
            if C >= 256:
                tC = max(128, ((pl.cdiv(C, 2) + 127) // 128) * 128)
            elif N >= 16:
                tN = max(8, _floor_mult(pl.cdiv(N, 2), 8))

        grid = (pl.cdiv(N, tN), pl.cdiv(C, tC))   # ragged last blocks are masked by Pallas
        out2 = pl.pallas_call(
            _add_pe_kernel,
            out_shape=jax.ShapeDtypeStruct((N, C), x.dtype),
            grid_spec=pltpu.PrefetchScalarGridSpec(
                num_scalar_prefetch=0,
                grid=grid,
                in_specs=[
                    pl.BlockSpec((tN, tC), lambda i, j: (i, j)),   # x rows/cols
                    pl.BlockSpec((1, tC), lambda i, j: (0, j)),    # matching pe columns
                ],
                out_specs=pl.BlockSpec((tN, tC), lambda i, j: (i, j)),
            ),
            compiler_params=pltpu.CompilerParams(
                dimension_semantics=("parallel", "parallel"),
                vmem_limit_bytes=vmem_limit,
            ),
            cost_estimate=cost,
            input_output_aliases=io_alias,
        )(x2, pe2)
        return out2.reshape(N, S, D)

    # -------- Path B: folded (N, S1, S2*D) layout (small batch) ----------------
    S1 = S // fold_S2
    C2 = fold_S2 * D
    x3 = x.reshape(N, S1, C2)
    pe3 = pe_s.reshape(S1, C2)
    target = min(8 << 20, vmem_limit // 8)        # pe tile is full-size here: 3 arrays x 2 bufs
    tS1, tC2 = _plan_fold(S1, C2, itemsize, target)

    grid = (N, pl.cdiv(S1, tS1), pl.cdiv(C2, tC2))
    out3 = pl.pallas_call(
        _add_pe_kernel,
        out_shape=jax.ShapeDtypeStruct((N, S1, C2), x.dtype),
        grid_spec=pltpu.PrefetchScalarGridSpec(
            num_scalar_prefetch=0,
            grid=grid,
            in_specs=[
                pl.BlockSpec((1, tS1, tC2), lambda n, i, j: (n, i, j)),  # x
                pl.BlockSpec((tS1, tC2), lambda n, i, j: (i, j)),        # pe (shared over batch)
            ],
            out_specs=pl.BlockSpec((1, tS1, tC2), lambda n, i, j: (n, i, j)),
        ),
        compiler_params=pltpu.CompilerParams(
            dimension_semantics=("parallel", "parallel", "parallel"),
            vmem_limit_bytes=vmem_limit,
        ),
        cost_estimate=cost,
        input_output_aliases=io_alias,
    )(x3, pe3)
    return out3.reshape(N, S, D)


if __name__ == "__main__":
    # Small shapes consistent with the module's forward: (N, S, D)
    N, S, D = 2, 8, 32
    max_len = 500

    key = jax.random.PRNGKey(0)
    x = jax.random.normal(key, (N, S, D), dtype=jnp.float32)
    pe = build_pe_table(D, max_len=max_len)       # built once, f32 (as in __init__)

    apply_fn = jax.jit(positional_encoding)       # tiling + pe prep happen at trace time
    out = jax.block_until_ready(apply_fn(x, pe))

    # Reference check in plain JAX (same semantics as the PyTorch forward).
    ref = x + pe[:S, :][None, :, :]
    assert out.shape == (N, S, D)
    assert jnp.allclose(out, ref, atol=1e-6, rtol=1e-6), "mismatch vs reference"

    print("KERNEL_OK")
</pallas_src>

<mosaic_0001>
module attributes {stable_mosaic.version = 11 : i64} {
  func.func @_add_pe_kernel(%arg0: i32, %arg1: i32, %arg2: memref<2x256xf32, #tpu.memory_space<vmem>>, %arg3: memref<1x256xf32, #tpu.memory_space<vmem>>, %arg4: memref<2x256xf32, #tpu.memory_space<vmem>>) attributes {dimension_semantics = [#tpu.dimension_semantics<parallel>, #tpu.dimension_semantics<parallel>], iteration_bounds = array<i64: 1, 1>, scalar_prefetch = 0 : i64, scratch_operands = 0 : i64, tpu.core_type = #tpu.core_type<tc>, window_params = [{transform_indices = @transform_0, window_bounds = array<i64: 2, 256>}, {transform_indices = @transform_1, window_bounds = array<i64: 1, 256>}, {transform_indices = @transform_2, window_bounds = array<i64: 2, 256>}]} {
    %c0 = arith.constant 0 : index
    %c0_0 = arith.constant 0 : index
    %0 = vector.load %arg2[%c0, %c0_0] : memref<2x256xf32, #tpu.memory_space<vmem>>, vector<2x256xf32>
    %c0_1 = arith.constant 0 : index
    %c0_2 = arith.constant 0 : index
    %1 = vector.load %arg3[%c0_1, %c0_2] : memref<1x256xf32, #tpu.memory_space<vmem>>, vector<1x256xf32>
    %2 = vector.broadcast %1 : vector<1x256xf32> to vector<2x256xf32>
    %3 = arith.addf %0, %2 : vector<2x256xf32>
    %c0_3 = arith.constant 0 : index
    %c0_4 = arith.constant 0 : index
    %4 = vector.load %arg4[%c0_3, %c0_4] : memref<2x256xf32, #tpu.memory_space<vmem>>, vector<2x256xf32>
    tpu.vector_store %arg4[%c0_3, %c0_4], %3 {strides = array<i32>} : memref<2x256xf32, #tpu.memory_space<vmem>>, vector<2x256xf32>,
    return
  }
  func.func @transform_0(%arg0: i32, %arg1: i32) -> (i32, i32) {
    %c0_i32 = arith.constant 0 : i32
    return %arg0, %arg1 : i32, i32
  }
  func.func @transform_1(%arg0: i32, %arg1: i32) -> (i32, i32) {
    %c0_i32 = arith.constant 0 : i32
    %c0_i32_0 = arith.constant 0 : i32
    return %c0_i32, %arg1 : i32, i32
  }
  func.func @transform_2(%arg0: i32, %arg1: i32) -> (i32, i32) {
    %c0_i32 = arith.constant 0 : i32
    return %arg0, %arg1 : i32, i32
  }
}

</mosaic_0001>

<bundles_post_ra>
// kernel: positional_encoding.1
= control target key start
LH: loop header
LB: loop body
LE: loop exit
PB: predicated region body
PF: predicated region fallthrough
CT: control target
= control target key end

     0   :  { %v14_v0 = vlaneseq  ;;  %v38_v1 = vmov 1983009808   ;;  %s63_s1 = inlined_call_operand.vmem [shape: f32[1,256], index: 1, kind: input, shape index: {}]   ;;  %s64_s0 = inlined_call_operand.vmem [shape: f32[2,256], index: 0, kind: input, shape index: {}]   ;;  %s65_s2 = inlined_call_operand.vmem [shape: f32[2,256], index: 2, kind: output, shape index: {}]  }
   0x1   :  { %v24_v2 = vunpack.c.l.s4 %v38_v1  ;;  %v12_v4 = vld [vmem:[%s63_s1] sm:$0x3] }
   0x2   :  { %v15_v3 = vshrl.u32 %v14_v0, 7  ;;  %v11_v12 = vld [vmem:[%s64_s0] sm:$0xf] }
   0x3   :  { %v25_v5 = vunpack.c.0.s8 %v24_v2 }
   0x4   :  { %v16_v6 = vsub.s32 0, %v15_v3  ;;  %v20_v7 = vsub.s32 1, %v15_v3 }
   0x5   :  { %v28_v10 = vsub.s32 %v25_v5, %v15_v3 }
   0x6   :  { %v17_v8 = vrot.slane %v12_v4, %v16_v6  ;;  %v21_v9 = vrot.slane %v12_v4, %v20_v7 }
   0x8   :  { %v22_v11 = vcombine.low %v17_v8, %v21_v9 }
   0xa   :  { %v29_v13 = vrot.slane %v22_v11, %v28_v10 }
   0xc   :  { %v31_v14 = vadd.f32 %v29_v13, %v11_v12 }
   0xe   :  { %32 = vst [vmem:[%s65_s2] sm:$0xf] %v31_v14 }

</bundles_post_ra>
